<compile_context>
chip_gen: v5e
topology: v5e:2x2
jax: 0.10.0
libtpu: 0.0.40
codegen_flags: <defaults>
</compile_context>

<pallas_src>
import math
import jax
import jax.numpy as jnp
from jax.experimental import pallas as pl
from jax.experimental.pallas import tpu as pltpu


def _caf_kernel(x_ref, cond_ref, w13_ref, w2_ref, bias_ref, z_ref):
    D = x_ref.shape[1]          # in_features of the flow
    twoD = w2_ref.shape[0]      # 2 * D (block-diag l2 weight)

    cond = cond_ref[...]        # (tm, Dc) bf16

    # One fused matmul for l1 and l3 of BOTH nets: (tm, Dc) @ (Dc, 4D) -> (tm, 4D)
    t = jnp.dot(cond, w13_ref[...], preferred_element_type=jnp.float32)

    pre_h = t[:, :twoD] + bias_ref[0:1, :]          # [l1_a(cond) | l1_b(cond)] + b1
    res = t[:, twoD:]                               # [l3_a(cond) | l3_b(cond)]

    h = jnp.maximum(pre_h, 0.0).astype(w2_ref.dtype)  # relu, back to bf16 for MXU

    # Block-diagonal l2 for both nets: (tm, 2D) @ (2D, 2D) -> (tm, 2D)
    ab = (jnp.dot(h, w2_ref[...], preferred_element_type=jnp.float32)
          + res + bias_ref[1:2, :])                 # + (b2 + b3)

    a_pre = ab[:, :D]                               # affine_a output (pre-nonlinearity)
    b_shift = ab[:, D:]                             # affine_b output

    # softplus (numerically stable), nonlinearity_a='softpuls' in the module
    a = jnp.maximum(a_pre, 0.0) + jnp.log(1.0 + jnp.exp(-jnp.abs(a_pre)))

    z = x_ref[...].astype(jnp.float32) * a + b_shift
    z_ref[...] = z.astype(z_ref.dtype)


def conditional_affine_flow(x, cond, w13, w2bd, bias, *, tm=128):
    """Fused ConditionalAffineFlow forward.

    x:    (B, D)      bf16
    cond: (B, Dc)     bf16
    w13:  (Dc, 4*D)   bf16   = concat([W1_a, W1_b, W3_a, W3_b], axis=1)
    w2bd: (2*D, 2*D)  bf16   = block_diag(W2_a, W2_b)
    bias: (2, 2*D)    f32    row0=[b1_a|b1_b], row1=[b2_a+b3_a | b2_b+b3_b]
    """
    B, D = x.shape
    Dc = cond.shape[1]
    assert B % tm == 0, "batch must be a multiple of the row tile"

    return pl.pallas_call(
        _caf_kernel,
        out_shape=jax.ShapeDtypeStruct((B, D), x.dtype),
        grid=(B // tm,),
        in_specs=[
            pl.BlockSpec((tm, D), lambda i: (i, 0)),        # x        (row-tiled)
            pl.BlockSpec((tm, Dc), lambda i: (i, 0)),       # cond_var (row-tiled)
            pl.BlockSpec((Dc, 4 * D), lambda i: (0, 0)),    # fused l1/l3 weights (resident)
            pl.BlockSpec((2 * D, 2 * D), lambda i: (0, 0)), # block-diag l2 weight (resident)
            pl.BlockSpec((2, 2 * D), lambda i: (0, 0)),     # packed biases (resident)
        ],
        out_specs=pl.BlockSpec((tm, D), lambda i: (i, 0)),
        compiler_params=pltpu.CompilerParams(
            dimension_semantics=("parallel",),
        ),
    )(x, cond, w13, w2bd, bias)


# ----------------------------------------------------------------------------
# Parameter construction / packing / reference
# ----------------------------------------------------------------------------

def _init_linear_params(key, in_features, out_features):
    """torch.nn.Linear.reset_parameters(): U(-1/sqrt(fan_in), 1/sqrt(fan_in)).
    Weight returned already transposed to (in_features, out_features)."""
    kw, kb = jax.random.split(key)
    bound = 1.0 / math.sqrt(in_features)
    w = jax.random.uniform(kw, (in_features, out_features), jnp.float32, -bound, bound)
    b = jax.random.uniform(kb, (1, out_features), jnp.float32, -bound, bound)
    return w, b


def _init_res_linear(key, in_features, out_features):
    k1, k2, k3 = jax.random.split(key, 3)
    w1, b1 = _init_linear_params(k1, in_features, out_features)
    w2, b2 = _init_linear_params(k2, out_features, out_features)
    w3, b3 = _init_linear_params(k3, in_features, out_features)   # has_res_layer=True
    return (w1, b1, w2, b2, w3, b3)


def _pack_params(params_a, params_b, dtype=jnp.bfloat16):
    w1a, b1a, w2a, b2a, w3a, b3a = params_a
    w1b, b1b, w2b, b2b, w3b, b3b = params_b
    D = w2a.shape[0]
    w13 = jnp.concatenate([w1a, w1b, w3a, w3b], axis=1).astype(dtype)      # (Dc, 4D)
    w2bd = jnp.zeros((2 * D, 2 * D), jnp.float32)
    w2bd = w2bd.at[:D, :D].set(w2a).at[D:, D:].set(w2b).astype(dtype)      # (2D, 2D)
    bias = jnp.concatenate(
        [jnp.concatenate([b1a, b1b], axis=1),
         jnp.concatenate([b2a + b3a, b2b + b3b], axis=1)], axis=0)          # (2, 2D) f32
    return w13, w2bd, bias


def _res_linear_ref(inp, w1, b1, w2, b2, w3, b3):
    h = jnp.maximum(inp @ w1 + b1, 0.0)
    return h @ w2 + b2 + (inp @ w3 + b3)


def conditional_affine_flow_reference(x, cond, params_a, params_b):
    a_pre = _res_linear_ref(cond, *params_a)
    b = _res_linear_ref(cond, *params_b)
    a = jnp.maximum(a_pre, 0.0) + jnp.log1p(jnp.exp(-jnp.abs(a_pre)))  # softplus
    return x * a + b


if __name__ == "__main__":
    # in_features D=128 (lane-dense output), cond_features Dc=32, batch 256 (2 row tiles).
    B, D, Dc = 256, 128, 32
    key = jax.random.PRNGKey(0)
    kx, kc, ka, kb = jax.random.split(key, 4)

    x_f32 = jax.random.normal(kx, (B, D), jnp.float32)
    cond_f32 = jax.random.normal(kc, (B, Dc), jnp.float32)

    params_a = _init_res_linear(ka, Dc, D)   # affine_a
    params_b = _init_res_linear(kb, Dc, D)   # affine_b

    # bf16 operands for the kernel (v6e/v7x MXU-native); f32 accumulation inside.
    x = x_f32.astype(jnp.bfloat16)
    cond = cond_f32.astype(jnp.bfloat16)
    w13, w2bd, bias = _pack_params(params_a, params_b, dtype=jnp.bfloat16)

    z = conditional_affine_flow(x, cond, w13, w2bd, bias, tm=128)
    z = jax.block_until_ready(z)

    # Reference in f32 using the same bf16-quantized inputs/weights.
    def up(p):
        return tuple(t.astype(jnp.bfloat16).astype(jnp.float32) for t in p)
    ref = conditional_affine_flow_reference(
        x.astype(jnp.float32), cond.astype(jnp.float32), up(params_a), up(params_b))

    assert z.shape == (B, D)
    assert jnp.allclose(z.astype(jnp.float32), ref, atol=5e-2, rtol=5e-2), (
        float(jnp.max(jnp.abs(z.astype(jnp.float32) - ref))))

    print("KERNEL_OK")
</pallas_src>

<mosaic_0001>
module attributes {stable_mosaic.version = 11 : i64} {
  func.func @_caf_kernel(%arg0: i32, %arg1: memref<128x128xbf16, #tpu.memory_space<vmem>>, %arg2: memref<128x32xbf16, #tpu.memory_space<vmem>>, %arg3: memref<32x512xbf16, #tpu.memory_space<vmem>>, %arg4: memref<256x256xbf16, #tpu.memory_space<vmem>>, %arg5: memref<2x256xf32, #tpu.memory_space<vmem>>, %arg6: memref<128x128xbf16, #tpu.memory_space<vmem>>) attributes {dimension_semantics = [#tpu.dimension_semantics<parallel>], iteration_bounds = array<i64: 2>, scalar_prefetch = 0 : i64, scratch_operands = 0 : i64, tpu.core_type = #tpu.core_type<tc>, window_params = [{transform_indices = @transform_0, window_bounds = array<i64: 128, 128>}, {transform_indices = @transform_1, window_bounds = array<i64: 128, 32>}, {pipeline_mode = #tpu.pipeline_mode<synchronous>, transform_indices = @transform_2, window_bounds = array<i64: 32, 512>}, {pipeline_mode = #tpu.pipeline_mode<synchronous>, transform_indices = @transform_3, window_bounds = array<i64: 256, 256>}, {pipeline_mode = #tpu.pipeline_mode<synchronous>, transform_indices = @transform_4, window_bounds = array<i64: 2, 256>}, {transform_indices = @transform_5, window_bounds = array<i64: 128, 128>}]} {
    %c0 = arith.constant 0 : index
    %c0_0 = arith.constant 0 : index
    %0 = vector.load %arg2[%c0, %c0_0] : memref<128x32xbf16, #tpu.memory_space<vmem>>, vector<128x32xbf16>
    %c0_1 = arith.constant 0 : index
    %c0_2 = arith.constant 0 : index
    %1 = vector.load %arg3[%c0_1, %c0_2] : memref<32x512xbf16, #tpu.memory_space<vmem>>, vector<32x512xbf16>
    %cst = arith.constant dense<0.000000e+00> : vector<128x512xf32>
    %2 = tpu.matmul %0, %1, %cst {dimension_numbers = #tpu.dot_dimension_numbers<[1], [0], [0], [1], [0, 0, 1, 1], [], []>} : vector<128x32xbf16>, vector<32x512xbf16>, vector<128x512xf32> -> vector<128x512xf32>
    %3 = vector.extract_strided_slice %2 {offsets = [0, 0], sizes = [128, 256], strides = [1, 1]} : vector<128x512xf32> to vector<128x256xf32>
    %c0_3 = arith.constant 0 : index
    %c0_4 = arith.constant 0 : index
    %4 = vector.load %arg5[%c0_3, %c0_4] : memref<2x256xf32, #tpu.memory_space<vmem>>, vector<1x256xf32>
    %5 = vector.broadcast %4 : vector<1x256xf32> to vector<128x256xf32>
    %6 = arith.addf %3, %5 : vector<128x256xf32>
    %7 = vector.extract_strided_slice %2 {offsets = [0, 256], sizes = [128, 256], strides = [1, 1]} : vector<128x512xf32> to vector<128x256xf32>
    %cst_5 = arith.constant 0.000000e+00 : f32
    %8 = vector.broadcast %cst_5 : f32 to vector<128x256xf32>
    %9 = arith.maximumf %6, %8 : vector<128x256xf32>
    %10 = arith.truncf %9 : vector<128x256xf32> to vector<128x256xbf16>
    %c0_6 = arith.constant 0 : index
    %c0_7 = arith.constant 0 : index
    %11 = vector.load %arg4[%c0_6, %c0_7] : memref<256x256xbf16, #tpu.memory_space<vmem>>, vector<256x256xbf16>
    %cst_8 = arith.constant dense<0.000000e+00> : vector<128x256xf32>
    %12 = tpu.matmul %10, %11, %cst_8 {dimension_numbers = #tpu.dot_dimension_numbers<[1], [0], [0], [1], [0, 0, 1, 1], [], []>} : vector<128x256xbf16>, vector<256x256xbf16>, vector<128x256xf32> -> vector<128x256xf32>
    %13 = arith.addf %12, %7 : vector<128x256xf32>
    %c1 = arith.constant 1 : index
    %c0_9 = arith.constant 0 : index
    %14 = vector.load %arg5[%c1, %c0_9] : memref<2x256xf32, #tpu.memory_space<vmem>>, vector<1x256xf32>
    %15 = vector.broadcast %14 : vector<1x256xf32> to vector<128x256xf32>
    %16 = arith.addf %13, %15 : vector<128x256xf32>
    %17 = vector.extract_strided_slice %16 {offsets = [0, 0], sizes = [128, 128], strides = [1, 1]} : vector<128x256xf32> to vector<128x128xf32>
    %18 = vector.extract_strided_slice %16 {offsets = [0, 128], sizes = [128, 128], strides = [1, 1]} : vector<128x256xf32> to vector<128x128xf32>
    %cst_10 = arith.constant 0.000000e+00 : f32
    %19 = vector.broadcast %cst_10 : f32 to vector<128x128xf32>
    %20 = arith.maximumf %17, %19 : vector<128x128xf32>
    %21 = math.absf %17 : vector<128x128xf32>
    %cst_11 = arith.constant 0.000000e+00 : f32
    %22 = vector.broadcast %cst_11 : f32 to vector<128x128xf32>
    %23 = arith.subf %22, %21 : vector<128x128xf32>
    %24 = math.exp %23 : vector<128x128xf32>
    %cst_12 = arith.constant 1.000000e+00 : f32
    %25 = vector.broadcast %cst_12 : f32 to vector<128x128xf32>
    %26 = arith.addf %25, %24 : vector<128x128xf32>
    %27 = math.log %26 : vector<128x128xf32>
    %28 = arith.addf %20, %27 : vector<128x128xf32>
    %c0_13 = arith.constant 0 : index
    %c0_14 = arith.constant 0 : index
    %29 = vector.load %arg1[%c0_13, %c0_14] : memref<128x128xbf16, #tpu.memory_space<vmem>>, vector<128x128xbf16>
    %30 = arith.extf %29 : vector<128x128xbf16> to vector<128x128xf32>
    %31 = arith.mulf %30, %28 : vector<128x128xf32>
    %32 = arith.addf %31, %18 : vector<128x128xf32>
    %33 = arith.truncf %32 : vector<128x128xf32> to vector<128x128xbf16>
    %c0_15 = arith.constant 0 : index
    %c0_16 = arith.constant 0 : index
    %34 = vector.load %arg6[%c0_15, %c0_16] : memref<128x128xbf16, #tpu.memory_space<vmem>>, vector<128x128xbf16>
    tpu.vector_store %arg6[%c0_15, %c0_16], %33 {strides = array<i32>} : memref<128x128xbf16, #tpu.memory_space<vmem>>, vector<128x128xbf16>,
    return
  }
  func.func @transform_0(%arg0: i32) -> (i32, i32) {
    %c0_i32 = arith.constant 0 : i32
    %c0_i32_0 = arith.constant 0 : i32
    return %arg0, %c0_i32 : i32, i32
  }
  func.func @transform_1(%arg0: i32) -> (i32, i32) {
    %c0_i32 = arith.constant 0 : i32
    %c0_i32_0 = arith.constant 0 : i32
    return %arg0, %c0_i32 : i32, i32
  }
  func.func @transform_2(%arg0: i32) -> (i32, i32) {
    %c0_i32 = arith.constant 0 : i32
    %c0_i32_0 = arith.constant 0 : i32
    %c0_i32_1 = arith.constant 0 : i32
    return %c0_i32, %c0_i32_0 : i32, i32
  }
  func.func @transform_3(%arg0: i32) -> (i32, i32) {
    %c0_i32 = arith.constant 0 : i32
    %c0_i32_0 = arith.constant 0 : i32
    %c0_i32_1 = arith.constant 0 : i32
    return %c0_i32, %c0_i32_0 : i32, i32
  }
  func.func @transform_4(%arg0: i32) -> (i32, i32) {
    %c0_i32 = arith.constant 0 : i32
    %c0_i32_0 = arith.constant 0 : i32
    %c0_i32_1 = arith.constant 0 : i32
    return %c0_i32, %c0_i32_0 : i32, i32
  }
  func.func @transform_5(%arg0: i32) -> (i32, i32) {
    %c0_i32 = arith.constant 0 : i32
    %c0_i32_0 = arith.constant 0 : i32
    return %arg0, %c0_i32 : i32, i32
  }
}

</mosaic_0001>

<bundles_post_ra>
// kernel: tpu_custom_call.1
= control target key start
LH: loop header
LB: loop body
LE: loop exit
PB: predicated region body
PF: predicated region fallthrough
CT: control target
= control target key end

     0   :  { %10 = vsyncpa [#allocation3], 0  ;;  %s2600_s0 = inlined_call_operand.vmem [shape: bf16[256,128], index: 0, kind: input, shape index: {}]   ;;  %s2601_s1 = inlined_call_operand.vmem [shape: bf16[256,32], index: 1, kind: input, shape index: {}]   ;;  %s2602_s2 = inlined_call_operand.hbm [shape: bf16[32,512], index: 2, kind: input, shape index: {}]   ;;  %s2603_s3 = inlined_call_operand.hbm [shape: bf16[256,256], index: 3, kind: input, shape index: {}]   ;;  %s2604_s4 = inlined_call_operand.vmem [shape: f32[2,256], index: 4, kind: input, shape index: {}]   ;;  %s2605_s5 = inlined_call_operand.hbm [shape: bf16[256,128], index: 5, kind: output, shape index: {}]  }
   0x1   :  { %11 = vsyncpa [#allocation6], 0 }
   0x2   :  { %12 = vsyncpa [#allocation4], 0 }
   0x3   :  { %14 = vsyncpa [#allocation4 + $0x1], 0  ;;  %s2151_s18 = smov 0   ;;  %s2153_s19 = smov 0  }
   0x4   :  { %s2155_s20 = smov 0   ;;  %s2157_s21 = smov 0  }
   0x5 LB: > { %s2172_s22 = sadd.s32 4294967295, %s2111_s21   ;;  %s1473_s23 = sadd.s32 4294967294, %s2111_s21   ;;  %s2111_s21 = sphi %s2157_s21, %s2612_s21   ;;  %s2107_s20 = sphi %s2155_s20, %s2611_s20   ;;  %s2103_s19 = sphi %s2153_s19, %s2610_s19   ;;  %s2099_s18 = sphi %s2151_s18, %s2609_s18  }
   0x6   : > { %s2176_s24 = sadd.s32 1, %s2111_s21   ;;  %s142_s25 = sadd.s32 1, %s2107_s20 }
   0x7   : > { %s139_s26 = ssub.s32 %s2111_s21, %s2176_s24  ;;  %p152_p0 = scmp.ne.s32.totalorder %s2107_s20, %s2103_s19 }
   0x8   : > { %p140_p1 = scmp.eq.s32.totalorder %s139_s26, 0  ;;  %p153_p2 = scmp.eq.s32.totalorder %s2172_s22, 1 }
   0x9   : > { %p158_p3 = scmp.ne.s32.totalorder %s2103_s19, %s2099_s18  ;;  %p159_p4 = scmp.eq.s32.totalorder %s1473_s23, 1 }
   0xa   : > { %s2187_s27 = scalar_select %p140_p1, %s2107_s20, %s142_s25  }
   0xb   : > { %p2189_p5 = por %p153_p2, %p152_p0  ;;  %p2193_p6 = por %p159_p4, %p158_p3 }
   0xc   : > { %p1474_p7 = scmp.ge.s32.totalorder %s2111_s21, 1  ;;  %p166_p8 = scmp.lt.s32.totalorder %s2111_s21, 3 }
   0xd   : > { %p1872_p9 = scmp.eq.s32.totalorder %s2172_s22, 0  ;;  %s177_s8 = sshll.u32 %s2602_s2, 4  ;;  %s178_s8 = int_to_ptr.hbm [resolvable:$true] %s177_s8 }
   0xe   : > { %p2200_p10 = pnand %p1474_p7, %p166_p8  ;;  %s2113_s9 = smov [#allocation2]  }
   0xf   : > { %s179_s10 = sshll.u32 %s2113_s9, 4  ;;  %s191_s13 = sshll.u32 %s2603_s3, 4  ;;  %s180_s10 = int_to_ptr.vmem [resolvable:$true] %s179_s10  ;;  %s192_s13 = int_to_ptr.hbm [resolvable:$true] %s191_s13 }
  0x10   : > { %p1861_p11 = pneg %p2200_p10  ;;  %s2114_s14 = smov 256  }
  0x11   : > { %s2115_s15 = smov 16   ;;  %s2116_s16 = smov [#allocation5]  }
  0x12   : > { %p1862_p12 = pnand %p1872_p9, %p1861_p11  ;;  %s193_s17 = sshll.u32 %s2116_s16, 4  ;;  %s194_s17 = int_to_ptr.vmem [resolvable:$true] %s193_s17 }
  0x13   : > { %s2117_s23 = smov 128   ;;  %s2118_s25 = smov 8  }
  0x14   : > { %1864 = dma.hbm_to_vmem [thread:$0]  (!%p1862_p12), %s178_s8, 1024, %s180_s10, [#allocation3], %s2114_s14, %s2114_s14, %s2115_s15  }
  0x15   : > { %1867 = dma.hbm_to_vmem [thread:$0]  (!%p1862_p12), %s192_s13, 4096, %s194_s17, [#allocation6], %s2117_s23, %s2117_s23, %s2118_s25  }
  0x16   : > { %230 = sbr.rel (%p2200_p10) target bundleno = 469 (0x1d5), region = 40 }
  0x1b   : > { %2086 = dma.done.wait (%p1872_p9), [#allocation3], 1024  }
  0x1c   : > { %2088 = vsyncadd (%p1872_p9), [#allocation3], 4294966272 }
  0x1d   : > { %2090 = dma.done.wait (%p1872_p9), [#allocation6], 4096  }
  0x1e   : > { %2092 = vsyncadd (%p1872_p9), [#allocation6], 4294963200  ;;  %s1482_s26 = sshll.u32 %s2172_s22, 4  ;;  %v1536_v0 = vld [vmem:[#allocation2 + $0x20] sm:$0xf]  ;;  %vm387_vm0 = vcmask 261120  }
  0x1f   : > { %p270_p13 = scmp.lt.s32.totalorder %s1482_s26, 31  ;;  %v1730_v1 = vld [vmem:[#allocation2 + $0x2c] sm:$0xf0]  ;;  %v1728_v2 = vld [vmem:[#allocation2 + $0x24] sm:$0xf]  ;;  %s266_s16 = sand.u32 1, %s2103_s19  }
  0x20   : > { %v1537_v3 = vor.u32 %v1730_v1, %v1536_v0  ;;  %v1538_v4 = vld [vmem:[#allocation2 + $0x30] sm:$0xf0]  ;;  %v1520_v5 = vld [vmem:[#allocation2] sm:$0xf]  ;;  %v1726_v6 = vld [vmem:[#allocation2 + $0xc] sm:$0xf0] }
  0x21   : > { %s2614_s26 = smov (!%p270_p13, %s1482_s26), 31  ;;  %v1541_v7 = vor.u32 %v1728_v2, %v1538_v4  ;;  %v1724_v8 = vld [vmem:[#allocation2 + $0x4] sm:$0xf]  ;;  %v1522_v9 = vld [vmem:[#allocation2 + $0x10] sm:$0xf0]  ;;  %v1521_v10 = vor.u32 %v1726_v6, %v1520_v5  ;;  %s1481_s17 = sshll.u32 %s266_s16, 6 }
  0x22   : > { %s1483_s30 = sshll.u32 %s2614_s26, 2  ;;  %418 = vmatpush.bf16.msra.mxu0 %v1537_v3  ;;  %v1544_v11 = vld [vmem:[#allocation2 + $0x28] sm:$0xf]  ;;  %v1731_v12 = vld [vmem:[#allocation2 + $0x34] sm:$0xf0]  ;;  %v1525_v14 = vor.u32 %v1724_v8, %v1522_v9  ;;  %s2439_s23 = scalar_lea.vmem [#allocation7], %s1481_s17 }
  0x23   : > { %s2233_s8 = scalar_lea.vmem %s2601_s1, %s1483_s30  ;;  %v1729_v13 = vld [vmem:[#allocation2 + $0x2c] sm:$0xf]  ;;  %467 = vmatpush.bf16.msra.mxu1 %v1541_v7  ;;  %v1545_v16 = vor.u32 %v1731_v12, %v1544_v11  ;;  %v1546_v17 = vld [vmem:[#allocation2 + $0x38] sm:$0xf0]  ;;  %v1528_v18 = vld [vmem:[#allocation2 + $0x8] sm:$0xf]  ;;  %s2405_s15 = scalar_lea.vmem %s2600_s0, %s1483_s30 }
  0x24   : > { %v1716_v15 = vld [vmem:[%s2233_s8] sm:$0xff]  ;;  %v1727_v19 = vld [vmem:[#allocation2 + $0x14] sm:$0xf0]  ;;  %v1549_v20 = vor.u32 %v1729_v13, %v1546_v17  ;;  %v1725_v21 = vld [vmem:[#allocation2 + $0xc] sm:$0xf]  ;;  %s1764_s25 = sshll.u32 %s2172_s22, 6 }
  0x25   : > { %v1530_v22 = vld [vmem:[#allocation2 + $0x18] sm:$0xf0]  ;;  %v1640_v23 = vld [vmem:[#allocation5 + $0x70] sm:$0xf]  ;;  %516 = vmatpush.bf16.msra.mxu2 %v1545_v16  ;;  %v1529_v24 = vor.u32 %v1727_v19, %v1528_v18  ;;  %v1747_v25 = vld [vmem:[#allocation5 + $0x74] sm:$0xf0]  ;;  %s1373_s6 = scalar_lea.hbm %s2605_s5, %s1764_s25 }
  0x26   : > { %v1704_v26 = vld [vmem:[#allocation5 + $0xf0] sm:$0xf]  ;;  %v1763_v27 = vld [vmem:[#allocation5 + $0xf4] sm:$0xf0]  ;;  %419 = vmatpush.bf16.msra.mxu0 %v1521_v10  ;;  %565 = vmatpush.bf16.msra.mxu3 %v1549_v20  ;;  %v1533_v28 = vor.u32 %v1725_v21, %v1530_v22  ;;  %v1641_v29 = vor.u32 %v1747_v25, %v1640_v23  ;;  %v1632_v31 = vld [vmem:[#allocation5 + $0x60] sm:$0xf] }
  0x27   : > { %v1705_v30 = vor.u32 %v1763_v27, %v1704_v26  ;;  %v1745_v32 = vld [vmem:[#allocation5 + $0x64] sm:$0xf0]  ;;  %468 = vmatpush.bf16.msra.mxu1 %v1525_v14  ;;  %v1696_v33 = vld [vmem:[#allocation5 + $0xe0] sm:$0xf]  ;;  %v1746_v37 = vld [vmem:[#allocation5 + $0x74] sm:$0xf] }
  0x28   : > { %v1761_v34 = vld [vmem:[#allocation5 + $0xe4] sm:$0xf0]  ;;  %v1633_v35 = vor.u32 %v1745_v32, %v1632_v31  ;;  %v1642_v38 = vld [vmem:[#allocation5 + $0x78] sm:$0xf0]  ;;  %v1762_v39 = vld [vmem:[#allocation5 + $0xf4] sm:$0xf] }
  0x29   : > { %1550 = vmatmul.msk.bf16.vlgmr.msra.gmra.mxu0 %vm387_vm0, %v1716_v15  ;;  %517 = vmatpush.bf16.msra.mxu2 %v1529_v24  ;;  %v1697_v36 = vor.u32 %v1761_v34, %v1696_v33  ;;  %v1645_v40 = vor.u32 %v1746_v37, %v1642_v38  ;;  %v1706_v41 = vld [vmem:[#allocation5 + $0xf8] sm:$0xf0]  ;;  %v1624_v43 = vld [vmem:[#allocation5 + $0x50] sm:$0xf]  ;;  %v1743_v44 = vld [vmem:[#allocation5 + $0x54] sm:$0xf0] }
  0x2a   : > { %886 = vmatpush.bf16.msrb.mxu0 %v1641_v29  ;;  %1558 = vmatmul.msk.bf16.vlgmr.msra.gmra.mxu1 %vm387_vm0, %v1716_v15  ;;  %v1709_v42 = vor.u32 %v1762_v39, %v1706_v41  ;;  %v1688_v45 = vld [vmem:[#allocation5 + $0xd0] sm:$0xf]  ;;  %v1625_v46 = vor.u32 %v1743_v44, %v1624_v43  ;;  %v1759_v47 = vld [vmem:[#allocation5 + $0xd4] sm:$0xf0]  ;;  %v1717_v49 = vld [vmem:[%s2233_s8 + $0x8] sm:$0xff]  ;;  %s1374_s22 = sshll.u32 %s2439_s23, 4  ;;  %s1375_s22 = int_to_ptr.vmem [resolvable:$true] %s1374_s22 }
  0x2b   : > { %935 = vmatpush.bf16.msrb.mxu1 %v1705_v30  ;;  %566 = vmatpush.bf16.msra.mxu3 %v1533_v28  ;;  %v1689_v48 = vor.u32 %v1759_v47, %v1688_v45  ;;  %v1744_v50 = vld [vmem:[#allocation5 + $0x64] sm:$0xf]  ;;  %v1634_v51 = vld [vmem:[#allocation5 + $0x68] sm:$0xf0]  ;;  %v1616_v56 = vld [vmem:[#allocation5 + $0x40] sm:$0xf] }
  0x2c   : > { %1566 = vmatmul.msk.bf16.vlgmr.msra.gmra.mxu2 %vm387_vm0, %v1716_v15  ;;  %v1760_v52 = vld [vmem:[#allocation5 + $0xe4] sm:$0xf]  ;;  %v1637_v53 = vor.u32 %v1744_v50, %v1634_v51  ;;  %v1698_v54 = vld [vmem:[#allocation5 + $0xe8] sm:$0xf0]  ;;  %v1741_v57 = vld [vmem:[#allocation5 + $0x44] sm:$0xf0] }
  0x2d   : > { %984 = vmatpush.bf16.msrb.mxu2 %v1645_v40  ;;  %v1701_v55 = vor.u32 %v1760_v52, %v1698_v54  ;;  %v1680_v58 = vld [vmem:[#allocation5 + $0xc0] sm:$0xf]  ;;  %v1617_v59 = vor.u32 %v1741_v57, %v1616_v56  ;;  %v1757_v60 = vld [vmem:[#allocation5 + $0xc4] sm:$0xf0]  ;;  %v1718_v62 = vld [vmem:[%s2233_s8 + $0x10] sm:$0xff]  ;;  %s1376_s7 = sshll.u32 %s1373_s6, 4  ;;  %s1377_s7 = int_to_ptr.hbm [resolvable:$true] %s1376_s7 }
  0x2e   : > { %887 = vmatpush.bf16.msrb.mxu0 %v1633_v35  ;;  %1574 = vmatmul.msk.bf16.vlgmr.msra.gmra.mxu3 %vm387_vm0, %v1716_v15  ;;  %v1681_v61 = vor.u32 %v1757_v60, %v1680_v58  ;;  %v1742_v63 = vld [vmem:[#allocation5 + $0x54] sm:$0xf]  ;;  %v1626_v0 = vld [vmem:[#allocation5 + $0x58] sm:$0xf0]  ;;  %v1608_v5 = vld [vmem:[#allocation5 + $0x30] sm:$0xf] }
  0x2f   : > { %936 = vmatpush.bf16.msrb.mxu1 %v1697_v36  ;;  %1033 = vmatpush.bf16.msrb.mxu3 %v1709_v42  ;;  %v1758_v1 = vld [vmem:[#allocation5 + $0xd4] sm:$0xf]  ;;  %v1629_v2 = vor.u32 %v1742_v63, %v1626_v0  ;;  %v1690_v3 = vld [vmem:[#allocation5 + $0xd8] sm:$0xf0]  ;;  %v1739_v6 = vld [vmem:[#allocation5 + $0x34] sm:$0xf0] }
  0x30   : > { %v1693_v4 = vor.u32 %v1758_v1, %v1690_v3  ;;  %v1672_v7 = vld [vmem:[#allocation5 + $0xb0] sm:$0xf]  ;;  %v1609_v8 = vor.u32 %v1739_v6, %v1608_v5  ;;  %v1755_v9 = vld [vmem:[#allocation5 + $0xb4] sm:$0xf0]  ;;  %v1740_v12 = vld [vmem:[#allocation5 + $0x44] sm:$0xf] }
  0x31   : > { %985 = vmatpush.bf16.msrb.mxu2 %v1637_v53  ;;  %v1673_v10 = vor.u32 %v1755_v9, %v1672_v7  ;;  %v1719_v11 = vld [vmem:[%s2233_s8 + $0x18] sm:$0xff]  ;;  %v1618_v13 = vld [vmem:[#allocation5 + $0x48] sm:$0xf0]  ;;  %v1756_v14 = vld [vmem:[#allocation5 + $0xc4] sm:$0xf]  ;;  %s2055_s9 = sshra.s32 %s1377_s7, 4  ;;  %s2056_s9 = int_to_ptr.hbm [resolvable:$true] %s2055_s9 }
  0x32   : > { %888 = vmatpush.bf16.msrb.mxu0 %v1625_v46  ;;  %v1621_v15 = vor.u32 %v1740_v12, %v1618_v13  ;;  %v1682_v16 = vld [vmem:[#allocation5 + $0xc8] sm:$0xf0]  ;;  %v1600_v18 = vld [vmem:[#allocation5 + $0x20] sm:$0xf]  ;;  %v1737_v19 = vld [vmem:[#allocation5 + $0x24] sm:$0xf0]  ;;  %p2062_p3 = scmp.lt.s32.totalorder %s2056_s9, %s2605_s5 }
  0x33   : > { %937 = vmatpush.bf16.msrb.mxu1 %v1689_v48  ;;  %1034 = vmatpush.bf16.msrb.mxu3 %v1701_v55  ;;  %v1685_v17 = vor.u32 %v1756_v14, %v1682_v16  ;;  %v1664_v20 = vld [vmem:[#allocation5 + $0xa0] sm:$0xf]  ;;  %v1601_v21 = vor.u32 %v1737_v19, %v1600_v18  ;;  %v1753_v22 = vld [vmem:[#allocation5 + $0xa4] sm:$0xf0]  ;;  %v1738_v25 = vld [vmem:[#allocation5 + $0x34] sm:$0xf] }
  0x34   : > { %v1665_v23 = vor.u32 %v1753_v22, %v1664_v20  ;;  %v1720_v24 = vld [vmem:[%s2233_s8 + $0x20] sm:$0xff]  ;;  %v1610_v26 = vld [vmem:[#allocation5 + $0x38] sm:$0xf0]  ;;  %v1754_v27 = vld [vmem:[#allocation5 + $0xb4] sm:$0xf]  ;;  %s2057_s10 = scalar_lea.hbm %s2056_s9, 64 }
  0x35   : > { %986 = vmatpush.bf16.msrb.mxu2 %v1629_v2  ;;  %v1613_v28 = vor.u32 %v1738_v25, %v1610_v26  ;;  %v1674_v29 = vld [vmem:[#allocation5 + $0xb8] sm:$0xf0]  ;;  %v1592_v31 = vld [vmem:[#allocation5 + $0x10] sm:$0xf]  ;;  %v1735_v32 = vld [vmem:[#allocation5 + $0x14] sm:$0xf0]  ;;  %p2058_p0 = scmp.ne.s32.totalorder %s2056_s9, %s2057_s10 }
  0x36   : > { %889 = vmatpush.bf16.msrb.mxu0 %v1617_v59  ;;  %v1677_v30 = vor.u32 %v1754_v27, %v1674_v29  ;;  %v1656_v33 = vld [vmem:[#allocation5 + $0x90] sm:$0xf]  ;;  %v1593_v34 = vor.u32 %v1735_v32, %v1592_v31  ;;  %v1751_v35 = vld [vmem:[#allocation5 + $0x94] sm:$0xf0]  ;;  %v1721_v37 = vld [vmem:[%s2233_s8 + $0x28] sm:$0xff]  ;;  %s2061_s13 = scalar_lea.hbm %s2605_s5, 128 }
  0x37   : > { %938 = vmatpush.bf16.msrb.mxu1 %v1681_v61  ;;  %1035 = vmatpush.bf16.msrb.mxu3 %v1693_v4  ;;  %v1657_v36 = vor.u32 %v1751_v35, %v1656_v33  ;;  %v1736_v38 = vld [vmem:[#allocation5 + $0x24] sm:$0xf]  ;;  %v1602_v39 = vld [vmem:[#allocation5 + $0x28] sm:$0xf0]  ;;  %v1584_v44 = vld [vmem:[#allocation5] sm:$0xf]  ;;  %p2059_p1 = pnand %p2058_p0, %p2189_p5  ;;  %p2063_p4 = scmp.lt.s32.totalorder %s2061_s13, %s2057_s10 }
  0x38   : > { %v1752_v40 = vld [vmem:[#allocation5 + $0xa4] sm:$0xf]  ;;  %v1605_v41 = vor.u32 %v1736_v38, %v1602_v39  ;;  %v1666_v42 = vld [vmem:[#allocation5 + $0xa8] sm:$0xf0]  ;;  %v1733_v45 = vld [vmem:[#allocation5 + $0x4] sm:$0xf0] }
  0x39   : > { %1551 = vmatmul.msk.bf16.gmra.mxu0 %vm387_vm0, %v1717_v49  ;;  %987 = vmatpush.bf16.msrb.mxu2 %v1621_v15  ;;  %v1669_v43 = vor.u32 %v1752_v40, %v1666_v42  ;;  %v1585_v46 = vor.u32 %v1733_v45, %v1584_v44  ;;  %v1722_v47 = vld [vmem:[%s2233_s8 + $0x30] sm:$0xff]  ;;  %v1648_v48 = vld [vmem:[#allocation5 + $0x80] sm:$0xf]  ;;  %v1594_v52 = vld [vmem:[#allocation5 + $0x18] sm:$0xf0]  ;;  %p2060_p2 = pneg %p2059_p1  ;;  %p2064_p7 = por %p2063_p4, %p2062_p3 }
  0x3a   : > { %1559 = vmatmul.msk.bf16.gmra.mxu1 %vm387_vm0, %v1717_v49  ;;  %890 = vmatpush.bf16.msrb.mxu0 %v1609_v8  ;;  %v1734_v50 = vld [vmem:[#allocation5 + $0x14] sm:$0xf]  ;;  %v1658_v54 = vld [vmem:[#allocation5 + $0x98] sm:$0xf0]  ;;  %v1732_v57 = vld [vmem:[#allocation5 + $0x4] sm:$0xf] }
  0x3b   : > { %939 = vmatpush.bf16.msrb.mxu1 %v1673_v10  ;;  %1036 = vmatpush.bf16.msrb.mxu3 %v1685_v17  ;;  %v1750_v53 = vld [vmem:[#allocation5 + $0x94] sm:$0xf]  ;;  %v1597_v55 = vor.u32 %v1734_v50, %v1594_v52  ;;  %v1586_v58 = vld [vmem:[#allocation5 + $0x8] sm:$0xf0]  ;;  %v1748_v59 = vld [vmem:[#allocation5 + $0x84] sm:$0xf]  ;;  %p2065_p8 = pnand %p2064_p7, %p2060_p2 }
  0x3c   : > { %1567 = vmatmul.msk.bf16.gmra.mxu2 %vm387_vm0, %v1717_v49  ;;  %v1661_v56 = vor.u32 %v1750_v53, %v1658_v54  ;;  %v1589_v60 = vor.u32 %v1732_v57, %v1586_v58  ;;  %v1650_v61 = vld [vmem:[#allocation5 + $0x88] sm:$0xf0]  ;;  %v1723_v63 = vld [vmem:[%s2233_s8 + $0x38] sm:$0xff]  ;;  %v608_v1 = vld [vmem:[%s2604_s4] ss:$2 sm:$0x3] }
  0x3d   : > { %988 = vmatpush.bf16.msrb.mxu2 %v1613_v28  ;;  %v2278_v3 = vperm.slane %v608_v1, 0  ;;  %v2280_v4 = vperm.slane %v608_v1, 1  ;;  %s1362_s8 = scalar_lea.sflag [#allocation4], %s266_s16 }
  0x3e   : > { %1575 = vmatmul.msk.bf16.gmra.mxu3 %vm387_vm0, %v1717_v49  ;;  %891 = vmatpush.bf16.msrb.mxu0 %v1601_v21  ;;  %v1749_v49 = vld [vmem:[#allocation5 + $0x84] sm:$0xf0] }
  0x3f   : > { %940 = vmatpush.bf16.msrb.mxu1 %v1665_v23  ;;  %1037 = vmatpush.bf16.msrb.mxu3 %v1677_v30  ;;  %v1649_v51 = vor.u32 %v1749_v49, %v1648_v48 }
  0x41   : > { %989 = vmatpush.bf16.msrb.mxu2 %v1605_v41 }
  0x42   : > { %892 = vmatpush.bf16.msrb.mxu0 %v1593_v34 }
  0x43   : > { %941 = vmatpush.bf16.msrb.mxu1 %v1657_v36  ;;  %1038 = vmatpush.bf16.msrb.mxu3 %v1669_v43 }
  0x45   : > { %990 = vmatpush.bf16.msrb.mxu2 %v1597_v55 }
  0x46   : > { %893 = vmatpush.bf16.msrb.mxu0 %v1585_v46 }
  0x47   : > { %942 = vmatpush.bf16.msrb.mxu1 %v1649_v51  ;;  %1039 = vmatpush.bf16.msrb.mxu3 %v1661_v56 }
  0x49   : > { %1552 = vmatmul.msk.bf16.gmra.mxu0 %vm387_vm0, %v1718_v62  ;;  %991 = vmatpush.bf16.msrb.mxu2 %v1589_v60 }
  0x4a   : > { %1560 = vmatmul.msk.bf16.gmra.mxu1 %vm387_vm0, %v1718_v62 }
  0x4c   : > { %1568 = vmatmul.msk.bf16.gmra.mxu2 %vm387_vm0, %v1718_v62 }
  0x4e   : > { %1576 = vmatmul.msk.bf16.gmra.mxu3 %vm387_vm0, %v1718_v62  ;;  %v1653_v62 = vor.u32 %v1748_v59, %v1650_v61 }
  0x50   : > { %1040 = vmatpush.bf16.msrb.mxu3 %v1653_v62 }
  0x59   : > { %1553 = vmatmul.msk.bf16.gmra.mxu0 %vm387_vm0, %v1719_v11 }
  0x5a   : > { %1561 = vmatmul.msk.bf16.gmra.mxu1 %vm387_vm0, %v1719_v11 }
  0x5c   : > { %1569 = vmatmul.msk.bf16.gmra.mxu2 %vm387_vm0, %v1719_v11 }
  0x5e   : > { %1577 = vmatmul.msk.bf16.gmra.mxu3 %vm387_vm0, %v1719_v11 }
  0x69   : > { %1554 = vmatmul.msk.bf16.gmra.mxu0 %vm387_vm0, %v1720_v24 }
  0x6a   : > { %1562 = vmatmul.msk.bf16.gmra.mxu1 %vm387_vm0, %v1720_v24 }
  0x6c   : > { %1570 = vmatmul.msk.bf16.gmra.mxu2 %vm387_vm0, %v1720_v24 }
  0x6e   : > { %1578 = vmatmul.msk.bf16.gmra.mxu3 %vm387_vm0, %v1720_v24 }
  0x79   : > { %1555 = vmatmul.msk.bf16.gmra.mxu0 %vm387_vm0, %v1721_v37 }
  0x7a   : > { %1563 = vmatmul.msk.bf16.gmra.mxu1 %vm387_vm0, %v1721_v37 }
  0x7c   : > { %1571 = vmatmul.msk.bf16.gmra.mxu2 %vm387_vm0, %v1721_v37 }
  0x7e   : > { %1579 = vmatmul.msk.bf16.gmra.mxu3 %vm387_vm0, %v1721_v37 }
  0x89   : > { %1556 = vmatmul.msk.bf16.gmra.mxu0 %vm387_vm0, %v1722_v47 }
  0x8a   : > { %1564 = vmatmul.msk.bf16.gmra.mxu1 %vm387_vm0, %v1722_v47 }
  0x8c   : > { %1572 = vmatmul.msk.bf16.gmra.mxu2 %vm387_vm0, %v1722_v47 }
  0x8e   : > { %1580 = vmatmul.msk.bf16.gmra.mxu3 %vm387_vm0, %v1722_v47 }
  0x99   : > { %1557 = vmatmul.msk.bf16.gmra.mxu0 %vm387_vm0, %v1723_v63 }
  0x9a   : > { %1565 = vmatmul.msk.bf16.gmra.mxu1 %vm387_vm0, %v1723_v63 }
  0x9c   : > { %1573 = vmatmul.msk.bf16.gmra.mxu2 %vm387_vm0, %v1723_v63 }
  0x9e   : > { %1581 = vmatmul.msk.bf16.gmra.mxu3 %vm387_vm0, %v1723_v63 }
  0xa6   : > { %v421_v0 = vpop.f32.mrf.mxu0 }
  0xa7   : > { %v470_v2 = vpop.f32.mrf.mxu1  ;;  %v614_v5 = vadd.f32 %v2278_v3, %v421_v0 }
  0xa8   : > { %v615_v6 = vadd.f32 %v2280_v4, %v470_v2 }
  0xa9   : > { %v646_v13 = vmax.f32 %v614_v5, 0.0 }
  0xaa   : > { %v647_v15 = vmax.f32 %v615_v6, 0.0 }
  0xae   : > { %v423_v7 = vpop.f32.mrf.mxu0 }
  0xaf   : > { %v616_v8 = vadd.f32 %v2278_v3, %v423_v7  ;;  %v472_v9 = vpop.f32.mrf.mxu1  ;;  %v2285_v10 = vpop.f32.mrf.mxu2 }
  0xb0   : > { %v617_v11 = vadd.f32 %v2280_v4, %v472_v9 }
  0xb1   : > { %v2288_v12 = vpop.f32.mrf.mxu3  ;;  %v648_v14 = vmax.f32 %v616_v8, 0.0 }
  0xb2   : > { %v649_v16 = vmax.f32 %v617_v11, 0.0 }
  0xb3   : > { %v678_v17 = vpack.c.bf16 %v648_v14, %v646_v13 }
  0xb4   : > { %v679_v18 = vpack.c.bf16 %v649_v16, %v647_v15 }
  0xb5   : > { %894 = vmatmul.bf16.vlgmr.msrb.gmra.mxu0 %v678_v17  ;;  %992 = vmatmul.bf16.vlgmr.msrb.gmra.mxu2 %v678_v17 }
  0xb6   : > { %943 = vmatmul.bf16.vlgmr.msrb.gmra.mxu1 %v679_v18  ;;  %1041 = vmatmul.bf16.vlgmr.msrb.gmra.mxu3 %v679_v18  ;;  %v426_v19 = vpop.f32.mrf.mxu0 }
  0xb7   : > { %v475_v20 = vpop.f32.mrf.mxu1  ;;  %v2290_v21 = vpop.f32.mrf.mxu2  ;;  %v618_v23 = vadd.f32 %v2278_v3, %v426_v19 }
  0xb8   : > { %v619_v24 = vadd.f32 %v2280_v4, %v475_v20 }
  0xb9   : > { %v2292_v22 = vpop.f32.mrf.mxu3  ;;  %v650_v31 = vmax.f32 %v618_v23, 0.0 }
  0xba   : > { %v651_v33 = vmax.f32 %v619_v24, 0.0 }
  0xbe   : > { %v428_v25 = vpop.f32.mrf.mxu0 }
  0xbf   : > { %v620_v26 = vadd.f32 %v2278_v3, %v428_v25  ;;  %v477_v27 = vpop.f32.mrf.mxu1  ;;  %v2297_v28 = vpop.f32.mrf.mxu2 }
  0xc0   : > { %v621_v29 = vadd.f32 %v2280_v4, %v477_v27 }
  0xc1   : > { %v2300_v30 = vpop.f32.mrf.mxu3  ;;  %v652_v32 = vmax.f32 %v620_v26, 0.0 }
  0xc2   : > { %v653_v34 = vmax.f32 %v621_v29, 0.0 }
  0xc3   : > { %v680_v35 = vpack.c.bf16 %v652_v32, %v650_v31 }
  0xc4   : > { %v681_v36 = vpack.c.bf16 %v653_v34, %v651_v33 }
  0xc5   : > { %899 = vmatmul.bf16.gmra.mxu0 %v680_v35  ;;  %997 = vmatmul.bf16.gmra.mxu2 %v680_v35 }
  0xc6   : > { %948 = vmatmul.bf16.gmra.mxu1 %v681_v36  ;;  %1046 = vmatmul.bf16.gmra.mxu3 %v681_v36  ;;  %v431_v37 = vpop.f32.mrf.mxu0 }
  0xc7   : > { %v480_v38 = vpop.f32.mrf.mxu1  ;;  %v2302_v39 = vpop.f32.mrf.mxu2  ;;  %v622_v41 = vadd.f32 %v2278_v3, %v431_v37 }
  0xc8   : > { %v623_v42 = vadd.f32 %v2280_v4, %v480_v38 }
  0xc9   : > { %v2304_v40 = vpop.f32.mrf.mxu3  ;;  %v654_v49 = vmax.f32 %v622_v41, 0.0 }
  0xca   : > { %v655_v51 = vmax.f32 %v623_v42, 0.0 }
  0xce   : > { %v433_v43 = vpop.f32.mrf.mxu0 }
  0xcf   : > { %v624_v44 = vadd.f32 %v2278_v3, %v433_v43  ;;  %v482_v45 = vpop.f32.mrf.mxu1  ;;  %v2309_v46 = vpop.f32.mrf.mxu2 }
  0xd0   : > { %v625_v47 = vadd.f32 %v2280_v4, %v482_v45 }
  0xd1   : > { %v2312_v48 = vpop.f32.mrf.mxu3  ;;  %v656_v50 = vmax.f32 %v624_v44, 0.0 }
  0xd2   : > { %v657_v52 = vmax.f32 %v625_v47, 0.0 }
  0xd3   : > { %v682_v53 = vpack.c.bf16 %v656_v50, %v654_v49 }
  0xd4   : > { %v683_v54 = vpack.c.bf16 %v657_v52, %v655_v51 }
  0xd5   : > { %904 = vmatmul.bf16.gmra.mxu0 %v682_v53  ;;  %1002 = vmatmul.bf16.gmra.mxu2 %v682_v53 }
  0xd6   : > { %953 = vmatmul.bf16.gmra.mxu1 %v683_v54  ;;  %1051 = vmatmul.bf16.gmra.mxu3 %v683_v54  ;;  %v436_v55 = vpop.f32.mrf.mxu0 }
  0xd7   : > { %v485_v56 = vpop.f32.mrf.mxu1  ;;  %v2314_v57 = vpop.f32.mrf.mxu2  ;;  %v626_v59 = vadd.f32 %v2278_v3, %v436_v55 }
  0xd8   : > { %v627_v60 = vadd.f32 %v2280_v4, %v485_v56 }
  0xd9   : > { %v2316_v58 = vpop.f32.mrf.mxu3  ;;  %v658_v5 = vmax.f32 %v626_v59, 0.0 }
  0xda   : > { %v659_v7 = vmax.f32 %v627_v60, 0.0 }
  0xde   : > { %v438_v61 = vpop.f32.mrf.mxu0 }
  0xdf   : > { %v628_v62 = vadd.f32 %v2278_v3, %v438_v61  ;;  %v487_v63 = vpop.f32.mrf.mxu1  ;;  %v2321_v0 = vpop.f32.mrf.mxu2 }
  0xe0   : > { %v629_v1 = vadd.f32 %v2280_v4, %v487_v63 }
  0xe1   : > { %v2324_v2 = vpop.f32.mrf.mxu3  ;;  %v660_v6 = vmax.f32 %v628_v62, 0.0 }
  0xe2   : > { %v661_v8 = vmax.f32 %v629_v1, 0.0 }
  0xe3   : > { %v684_v9 = vpack.c.bf16 %v660_v6, %v658_v5 }
  0xe4   : > { %v685_v11 = vpack.c.bf16 %v661_v8, %v659_v7 }
  0xe5   : > { %909 = vmatmul.bf16.gmra.mxu0 %v684_v9  ;;  %1007 = vmatmul.bf16.gmra.mxu2 %v684_v9 }
  0xe6   : > { %958 = vmatmul.bf16.gmra.mxu1 %v685_v11  ;;  %1056 = vmatmul.bf16.gmra.mxu3 %v685_v11  ;;  %v441_v13 = vpop.f32.mrf.mxu0 }
  0xe7   : > { %v490_v14 = vpop.f32.mrf.mxu1  ;;  %v2326_v15 = vpop.f32.mrf.mxu2  ;;  %v630_v17 = vadd.f32 %v2278_v3, %v441_v13 }
  0xe8   : > { %v631_v18 = vadd.f32 %v2280_v4, %v490_v14 }
  0xe9   : > { %v2328_v16 = vpop.f32.mrf.mxu3  ;;  %v662_v27 = vmax.f32 %v630_v17, 0.0 }
  0xea   : > { %v663_v31 = vmax.f32 %v631_v18, 0.0 }
  0xee   : > { %v443_v19 = vpop.f32.mrf.mxu0 }
  0xef   : > { %v632_v20 = vadd.f32 %v2278_v3, %v443_v19  ;;  %v492_v23 = vpop.f32.mrf.mxu1  ;;  %v2333_v24 = vpop.f32.mrf.mxu2 }
  0xf0   : > { %v633_v25 = vadd.f32 %v2280_v4, %v492_v23 }
  0xf1   : > { %v2336_v26 = vpop.f32.mrf.mxu3  ;;  %v664_v29 = vmax.f32 %v632_v20, 0.0 }
  0xf2   : > { %v665_v32 = vmax.f32 %v633_v25, 0.0 }
  0xf3   : > { %v686_v33 = vpack.c.bf16 %v664_v29, %v662_v27 }
  0xf4   : > { %v687_v34 = vpack.c.bf16 %v665_v32, %v663_v31 }
  0xf5   : > { %914 = vmatmul.bf16.gmra.mxu0 %v686_v33  ;;  %1012 = vmatmul.bf16.gmra.mxu2 %v686_v33 }
  0xf6   : > { %963 = vmatmul.bf16.gmra.mxu1 %v687_v34  ;;  %1061 = vmatmul.bf16.gmra.mxu3 %v687_v34  ;;  %v446_v35 = vpop.f32.mrf.mxu0 }
  0xf7   : > { %v495_v36 = vpop.f32.mrf.mxu1  ;;  %v2338_v37 = vpop.f32.mrf.mxu2  ;;  %v634_v41 = vadd.f32 %v2278_v3, %v446_v35 }
  0xf8   : > { %v635_v42 = vadd.f32 %v2280_v4, %v495_v36 }
  0xf9   : > { %v2340_v38 = vpop.f32.mrf.mxu3  ;;  %v666_v51 = vmax.f32 %v634_v41, 0.0 }
  0xfa   : > { %v667_v53 = vmax.f32 %v635_v42, 0.0 }
  0xfe   : > { %v448_v43 = vpop.f32.mrf.mxu0 }
  0xff   : > { %v636_v44 = vadd.f32 %v2278_v3, %v448_v43  ;;  %v497_v45 = vpop.f32.mrf.mxu1  ;;  %v2345_v47 = vpop.f32.mrf.mxu2 }
 0x100   : > { %v637_v49 = vadd.f32 %v2280_v4, %v497_v45 }
 0x101   : > { %v2348_v50 = vpop.f32.mrf.mxu3  ;;  %v668_v52 = vmax.f32 %v636_v44, 0.0 }
 0x102   : > { %v669_v54 = vmax.f32 %v637_v49, 0.0 }
 0x103   : > { %v688_v55 = vpack.c.bf16 %v668_v52, %v666_v51 }
 0x104   : > { %v689_v56 = vpack.c.bf16 %v669_v54, %v667_v53 }
 0x105   : > { %919 = vmatmul.bf16.gmra.mxu0 %v688_v55  ;;  %1017 = vmatmul.bf16.gmra.mxu2 %v688_v55 }
 0x106   : > { %968 = vmatmul.bf16.gmra.mxu1 %v689_v56  ;;  %1066 = vmatmul.bf16.gmra.mxu3 %v689_v56  ;;  %v451_v59 = vpop.f32.mrf.mxu0 }
 0x107   : > { %v500_v60 = vpop.f32.mrf.mxu1  ;;  %v2350_v61 = vpop.f32.mrf.mxu2  ;;  %v638_v63 = vadd.f32 %v2278_v3, %v451_v59 }
 0x108   : > { %v639_v1 = vadd.f32 %v2280_v4, %v500_v60 }
 0x109   : > { %v2352_v62 = vpop.f32.mrf.mxu3  ;;  %v670_v11 = vmax.f32 %v638_v63, 0.0 }
 0x10a   : > { %v671_v17 = vmax.f32 %v639_v1, 0.0 }
 0x10e   : > { %v453_v5 = vpop.f32.mrf.mxu0 }
 0x10f   : > { %v640_v6 = vadd.f32 %v2278_v3, %v453_v5  ;;  %v502_v7 = vpop.f32.mrf.mxu1  ;;  %v2358_v9 = vpop.f32.mrf.mxu2 }
 0x110   : > { %v641_v8 = vadd.f32 %v2280_v4, %v502_v7 }
 0x111   : > { %v672_v13 = vmax.f32 %v640_v6, 0.0  ;;  %v2360_v14 = vpop.f32.mrf.mxu3 }
 0x112   : > { %v673_v18 = vmax.f32 %v641_v8, 0.0 }
 0x113   : > { %v690_v19 = vpack.c.bf16 %v672_v13, %v670_v11 }
 0x114   : > { %v691_v20 = vpack.c.bf16 %v673_v18, %v671_v17 }
 0x115   : > { %924 = vmatmul.bf16.gmra.mxu0 %v690_v19  ;;  %1022 = vmatmul.bf16.gmra.mxu2 %v690_v19 }
 0x116   : > { %973 = vmatmul.bf16.gmra.mxu1 %v691_v20  ;;  %1071 = vmatmul.bf16.gmra.mxu3 %v691_v20  ;;  %v456_v23 = vpop.f32.mrf.mxu0 }
 0x117   : > { %v505_v25 = vpop.f32.mrf.mxu1  ;;  %v2362_v27 = vpop.f32.mrf.mxu2  ;;  %v642_v31 = vadd.f32 %v2278_v3, %v456_v23 }
 0x118   : > { %v643_v32 = vadd.f32 %v2280_v4, %v505_v25 }
 0x119   : > { %v2364_v29 = vpop.f32.mrf.mxu3  ;;  %v674_v41 = vmax.f32 %v642_v31, 0.0 }
 0x11a   : > { %v675_v43 = vmax.f32 %v643_v32, 0.0 }
 0x11e   : > { %v458_v33 = vpop.f32.mrf.mxu0 }
 0x11f   : > { %v644_v34 = vadd.f32 %v2278_v3, %v458_v33  ;;  %v507_v35 = vpop.f32.mrf.mxu1  ;;  %v2370_v51 = vpop.f32.mrf.mxu2 }
 0x120   : > { %v645_v36 = vadd.f32 %v2280_v4, %v507_v35  ;;  %v1710_v4 = vld [vmem:[%s2604_s4 + $0x1] ss:$2 sm:$0x3] }
 0x121   : > { %v676_v42 = vmax.f32 %v644_v34, 0.0  ;;  %v2372_v52 = vpop.f32.mrf.mxu3  ;;  %v2382_v59 = vperm.slane %v1710_v4, 0 }
 0x122   : > { %v677_v44 = vmax.f32 %v645_v36, 0.0 }
 0x123   : > { %v692_v45 = vpack.c.bf16 %v676_v42, %v674_v41 }
 0x124   : > { %v693_v49 = vpack.c.bf16 %v677_v44, %v675_v43 }
 0x125   : > { %929 = vmatmul.bf16.gmra.mxu0 %v692_v45  ;;  %1027 = vmatmul.bf16.gmra.mxu2 %v692_v45 }
 0x126   : > { %978 = vmatmul.bf16.gmra.mxu1 %v693_v49  ;;  %1076 = vmatmul.bf16.gmra.mxu3 %v693_v49 }
 0x127   : > { %v2374_v53 = vpop.f32.mrf.mxu2 }
 0x129   : > { %v2376_v3 = vpop.f32.mrf.mxu3 }
 0x132   : > { %v895_v54 = vpop.f32.mrf.mxu0 }
 0x133   : > { %v896_v55 = vadd.f32 %v895_v54, %v2285_v10  ;;  %v944_v56 = vpop.f32.mrf.mxu1 }
 0x135   : > { %v945_v60 = vadd.f32 %v944_v56, %v896_v55 }
 0x137   : > { %v1089_v63 = vadd.f32 %v2382_v59, %v945_v60 }
 0x138   : > { %v993_v1 = vpop.f32.mrf.mxu2 }
 0x139   : > { %v1137_v5 = vand.u32 2147483647, %v1089_v63  ;;  %v1042_v6 = vpop.f32.mrf.mxu3 }
 0x13a   : > { %v897_v7 = vpop.f32.mrf.mxu0 }
 0x13b   : > { %v1153_v8 = vsub.f32 0.0, %v1137_v5  ;;  %v898_v11 = vadd.f32 %v897_v7, %v2290_v21  ;;  %v946_v13 = vpop.f32.mrf.mxu1 }
 0x13d   : > { %v1169_v17 = vmul.f32 1.442695, %v1153_v8  ;;  %v947_v18 = vadd.f32 %v946_v13, %v898_v11 }
 0x13f   : > { %1917 = vpow2.f32 %v1169_v17  ;;  %v2387_v19 = vadd.f32 %v2382_v59, %v947_v18  ;;  %v994_v18 = vadd.f32 %v993_v1, %v2288_v12 }
 0x140   : > { %v995_v10 = vpop.f32.mrf.mxu2 }
 0x141   : > { %v1138_v20 = vand.u32 2147483647, %v2387_v19  ;;  %v1044_v23 = vpop.f32.mrf.mxu3  ;;  %v1122_v12 = vmax.f32 %v2387_v19, 0.0 }
 0x142   : > { %v900_v25 = vpop.f32.mrf.mxu0 }
 0x143   : > { %v1154_v31 = vsub.f32 0.0, %v1138_v20  ;;  %v901_v32 = vadd.f32 %v900_v25, %v2297_v28  ;;  %v949_v33 = vpop.f32.mrf.mxu1  ;;  %v1766_v20 = vld [vmem:[%s2405_s15] sm:$0xff]  }
 0x145   : > { %v1918_v34 = vpop.eup %1917  ;;  %v1171_v35 = vmul.f32 1.442695, %v1154_v31  ;;  %v950_v36 = vadd.f32 %v949_v33, %v901_v32  ;;  %v1121_v31 = vmax.f32 %v1089_v63, 0.0  ;;  %v996_v32 = vadd.f32 %v995_v10, %v2292_v22 }
 0x146   : > { %v1201_v21 = vadd.f32 1.0, %v1918_v34  ;;  %v1768_v63 = vunpack.c.h.bf16 %v1766_v20 }
 0x147   : > { %1919 = vpow2.f32 %v1171_v35  ;;  %v2392_v41 = vadd.f32 %v2382_v59, %v950_v36  ;;  %v2419_v36 = vperm.slane %v1710_v4, 1  ;;  %v1045_v10 = vadd.f32 %v1044_v23, %v996_v32 }
 0x148   : > { %1921 = vlog2.f32 %v1201_v21  ;;  %v2394_v42 = vpop.f32.mrf.mxu2 }
 0x149   : > { %v1139_v43 = vand.u32 2147483647, %v2392_v41  ;;  %v2397_v44 = vpop.f32.mrf.mxu3  ;;  %v1092_v23 = vadd.f32 %v2419_v36, %v1045_v10 }
 0x14a   : > { %v902_v45 = vpop.f32.mrf.mxu0 }
 0x14b   : > { %v1155_v49 = vsub.f32 0.0, %v1139_v43  ;;  %v903_v28 = vadd.f32 %v902_v45, %v2302_v39  ;;  %v951_v54 = vpop.f32.mrf.mxu1  ;;  %v1767_v45 = vunpack.c.l.bf16 %v1766_v20 }
 0x14d   : > { %v1920_v55 = vpop.eup %1919  ;;  %v1173_v56 = vmul.f32 1.442695, %v1155_v49  ;;  %v952_v60 = vadd.f32 %v951_v54, %v903_v28 }
 0x14e   : > { %v1922_v5 = vpop.eup %1921  ;;  %v1202_v7 = vadd.f32 1.0, %v1920_v55  ;;  %v1043_v55 = vadd.f32 %v1042_v6, %v994_v18 }
 0x14f   : > { %1923 = vpow2.f32 %v1173_v56  ;;  %v2408_v8 = vadd.f32 %v2382_v59, %v952_v60  ;;  %v1218_v39 = vmul.f32 0.6931472, %v1922_v5 }
 0x150   : > { %1925 = vlog2.f32 %v1202_v7  ;;  %v2410_v11 = vpop.f32.mrf.mxu2  ;;  %v1090_v19 = vadd.f32 %v2419_v36, %v1043_v55  ;;  %v1837_v55 = vld [vmem:[%s2405_s15 + $0x8] sm:$0xff]  }
 0x151   : > { %v1140_v13 = vand.u32 2147483647, %v2408_v8  ;;  %v2413_v17 = vpop.f32.mrf.mxu3  ;;  %v1249_v43 = vadd.f32 %v1218_v39, %v1121_v31 }
 0x152   : > { %v905_v25 = vpop.f32.mrf.mxu0 }
 0x153   : > { %v1156_v33 = vsub.f32 0.0, %v1140_v13  ;;  %v906_v34 = vadd.f32 %v905_v25, %v2309_v46  ;;  %v954_v35 = vpop.f32.mrf.mxu1  ;;  %v1297_v56 = vmul.f32 %v1767_v45, %v1249_v43 }
 0x155   : > { %v1924_v21 = vpop.eup %1923  ;;  %v1175_v49 = vmul.f32 1.442695, %v1156_v33  ;;  %v955_v28 = vadd.f32 %v954_v35, %v906_v34  ;;  %v1313_v31 = vadd.f32 %v1297_v56, %v1090_v19 }
 0x156   : > { %v1926_v54 = vpop.eup %1925  ;;  %v1203_v1 = vadd.f32 1.0, %v1924_v21 }
 0x157   : > { %v1220_v22 = vmul.f32 0.6931472, %v1926_v54  ;;  %1927 = vpow2.f32 %v1175_v49  ;;  %v2423_v46 = vadd.f32 %v2382_v59, %v955_v28  ;;  %v999_v54 = vadd.f32 %v2394_v42, %v2300_v30 }
 0x158   : > { %1929 = vlog2.f32 %v1203_v1  ;;  %v2426_v4 = vpop.f32.mrf.mxu2  ;;  %v1123_v1 = vmax.f32 %v2392_v41, 0.0  ;;  %v1124_v42 = vmax.f32 %v2408_v8, 0.0 }
 0x159   : > { %v1250_v60 = vadd.f32 %v1220_v22, %v1122_v12  ;;  %v1141_v5 = vand.u32 2147483647, %v2423_v46  ;;  %v2429_v6 = vpop.f32.mrf.mxu3  ;;  %v1001_v22 = vadd.f32 %v2410_v11, %v2304_v40  ;;  %v1048_v30 = vadd.f32 %v2397_v44, %v999_v54 }
 0x15a   : > { %v907_v7 = vpop.f32.mrf.mxu0 }
 0x15b   : > { %v1298_v39 = vmul.f32 %v1768_v63, %v1250_v60  ;;  %v1157_v13 = vsub.f32 0.0, %v1141_v5  ;;  %v908_v18 = vadd.f32 %v907_v7, %v2314_v57  ;;  %v956_v20 = vpop.f32.mrf.mxu1  ;;  %v1771_v7 = vunpack.c.l.bf16 %v1837_v55 }
 0x15c   : > { %v1094_v44 = vadd.f32 %v2419_v36, %v1048_v30 }
 0x15d   : > { %v1928_v25 = vpop.eup %1927  ;;  %v1314_v32 = vadd.f32 %v1298_v39, %v1092_v23  ;;  %v1177_v33 = vmul.f32 1.442695, %v1157_v13  ;;  %v957_v34 = vadd.f32 %v956_v20, %v908_v18  ;;  %v1772_v18 = vunpack.c.h.bf16 %v1837_v55 }
 0x15e   : > { %v1930_v35 = vpop.eup %1929  ;;  %v1204_v21 = vadd.f32 1.0, %v1928_v25  ;;  %v1050_v25 = vadd.f32 %v2413_v17, %v1001_v22 }
 0x15f   : > { %v1800_v43 = vpack.c.bf16 %v1314_v32, %v1313_v31  ;;  %1931 = vpow2.f32 %v1177_v33  ;;  %v2437_v45 = vadd.f32 %v2382_v59, %v957_v34  ;;  %v1222_v57 = vmul.f32 0.6931472, %v1930_v35 }
 0x160   : > { %1933 = vlog2.f32 %v1204_v21  ;;  %v1005_v49 = vpop.f32.mrf.mxu2  ;;  %v1096_v8 = vadd.f32 %v2419_v36, %v1050_v25 }
 0x161   : > { %1801 = vst [vmem:[%s2439_s23] sm:$0xff] %v1800_v43   ;;  %v1142_v28 = vand.u32 2147483647, %v2437_v45  ;;  %v2446_v12 = vpop.f32.mrf.mxu3  ;;  %v1251_v19 = vadd.f32 %v1222_v57, %v1123_v1 }
 0x162   : > { %v910_v63 = vpop.f32.mrf.mxu0 }
 0x163   : > { %v1158_v10 = vsub.f32 0.0, %v1142_v28  ;;  %v911_v56 = vadd.f32 %v910_v63, %v2321_v0  ;;  %v959_v60 = vpop.f32.mrf.mxu1  ;;  %v1299_v11 = vmul.f32 %v1771_v7, %v1251_v19  ;;  %v1004_v19 = vadd.f32 %v2426_v4, %v2312_v48  ;;  %v1838_v7 = vld [vmem:[%s2405_s15 + $0x10] sm:$0xff]  }
 0x164   : > { %v1775_v25 = vunpack.c.l.bf16 %v1838_v7  ;;  %v1126_v48 = vmax.f32 %v2437_v45, 0.0  ;;  %v1776_v4 = vunpack.c.h.bf16 %v1838_v7 }
 0x165   : > { %v1932_v5 = vpop.eup %1931  ;;  %v1179_v23 = vmul.f32 1.442695, %v1158_v10  ;;  %v960_v39 = vadd.f32 %v959_v60, %v911_v56  ;;  %v1315_v28 = vadd.f32 %v1299_v11, %v1094_v44  ;;  %v1053_v44 = vadd.f32 %v2429_v6, %v1004_v19 }
 0x166   : > { %v1934_v13 = vpop.eup %1933  ;;  %v1205_v20 = vadd.f32 1.0, %v1932_v5 }
 0x167   : > { %v1224_v41 = vmul.f32 0.6931472, %v1934_v13  ;;  %1935 = vpow2.f32 %v1179_v23  ;;  %v2456_v40 = vadd.f32 %v2382_v59, %v960_v39  ;;  %v1125_v39 = vmax.f32 %v2423_v46, 0.0 }
 0x168   : > { %1937 = vlog2.f32 %v1205_v20  ;;  %v2458_v0 = vpop.f32.mrf.mxu2  ;;  %v1006_v13 = vadd.f32 %v1005_v49, %v2316_v58 }
 0x169   : > { %v1252_v31 = vadd.f32 %v1224_v41, %v1124_v42  ;;  %v1143_v32 = vand.u32 2147483647, %v2456_v40  ;;  %v2464_v43 = vpop.f32.mrf.mxu3 }
 0x16a   : > { %v912_v33 = vpop.f32.mrf.mxu0  ;;  %v1055_v58 = vadd.f32 %v2446_v12, %v1006_v13  ;;  %v1009_v13 = vadd.f32 %v2458_v0, %v2324_v2 }
 0x16b   : > { %v1300_v34 = vmul.f32 %v1772_v18, %v1252_v31  ;;  %v1159_v35 = vsub.f32 0.0, %v1143_v32  ;;  %v913_v17 = vadd.f32 %v912_v33, %v2326_v15  ;;  %v961_v21 = vpop.f32.mrf.mxu1 }
 0x16d   : > { %v1936_v57 = vpop.eup %1935  ;;  %v1316_v54 = vadd.f32 %v1300_v34, %v1096_v8  ;;  %v1181_v55 = vmul.f32 1.442695, %v1159_v35  ;;  %v962_v63 = vadd.f32 %v961_v21, %v913_v17  ;;  %v1098_v17 = vadd.f32 %v2419_v36, %v1053_v44 }
 0x16e   : > { %v1938_v1 = vpop.eup %1937  ;;  %v1206_v22 = vadd.f32 1.0, %v1936_v57  ;;  %v1100_v21 = vadd.f32 %v2419_v36, %v1055_v58  ;;  %v1058_v58 = vadd.f32 %v2464_v43, %v1009_v13  ;;  %v1840_v13 = vld [vmem:[%s2405_s15 + $0x20] sm:$0xff]  }
 0x16f   : > { %v1805_v10 = vpack.c.bf16 %v1316_v54, %v1315_v28  ;;  %1939 = vpow2.f32 %v1181_v55  ;;  %v2467_v56 = vadd.f32 %v2382_v59, %v962_v63  ;;  %v1226_v15 = vmul.f32 0.6931472, %v1938_v1 }
 0x170   : > { %1941 = vlog2.f32 %v1206_v22  ;;  %v1010_v60 = vpop.f32.mrf.mxu2 }
 0x171   : > { %1844 = vst [vmem:[%s2439_s23 + $0x8] sm:$0xff] %v1805_v10   ;;  %v1144_v5 = vand.u32 2147483647, %v2467_v56  ;;  %v1253_v41 = vadd.f32 %v1226_v15, %v1125_v39  ;;  %v1059_v8 = vpop.f32.mrf.mxu3  ;;  %v1128_v2 = vmax.f32 %v2467_v56, 0.0 }
 0x172   : > { %v915_v23 = vpop.f32.mrf.mxu0 }
 0x173   : > { %v1160_v30 = vsub.f32 0.0, %v1144_v5  ;;  %v916_v42 = vadd.f32 %v915_v23, %v2333_v24  ;;  %v964_v18 = vpop.f32.mrf.mxu1  ;;  %v1301_v49 = vmul.f32 %v1775_v25, %v1253_v41 }
 0x175   : > { %v1940_v20 = vpop.eup %1939  ;;  %v1183_v11 = vmul.f32 1.442695, %v1160_v30  ;;  %v965_v31 = vadd.f32 %v964_v18, %v916_v42  ;;  %v1317_v63 = vadd.f32 %v1301_v49, %v1098_v17  ;;  %v1839_v30 = vld [vmem:[%s2405_s15 + $0x18] sm:$0xff]   ;;  %v1127_v18 = vmax.f32 %v2456_v40, 0.0 }
 0x176   : > { %v1942_v32 = vpop.eup %1941  ;;  %v1207_v33 = vadd.f32 1.0, %v1940_v20  ;;  %v1011_v20 = vadd.f32 %v1010_v60, %v2328_v16  ;;  %v1780_v0 = vunpack.c.h.bf16 %v1839_v30  ;;  %v1102_v17 = vadd.f32 %v2419_v36, %v1058_v58 }
 0x177   : > { %v1228_v46 = vmul.f32 0.6931472, %v1942_v32  ;;  %1943 = vpow2.f32 %v1183_v11  ;;  %v2481_v24 = vadd.f32 %v2382_v59, %v965_v31 }
 0x178   : > { %1945 = vlog2.f32 %v1207_v33  ;;  %v2485_v6 = vpop.f32.mrf.mxu2 }
 0x179   : > { %v1254_v34 = vadd.f32 %v1228_v46, %v1126_v48  ;;  %v1145_v35 = vand.u32 2147483647, %v2481_v24  ;;  %v2492_v23 = vpop.f32.mrf.mxu3  ;;  %v1779_v48 = vunpack.c.l.bf16 %v1839_v30 }
 0x17a   : > { %v917_v45 = vpop.f32.mrf.mxu0 }
 0x17b   : > { %v1302_v57 = vmul.f32 %v1776_v4, %v1254_v34  ;;  %v1161_v28 = vsub.f32 0.0, %v1145_v35  ;;  %v918_v12 = vadd.f32 %v917_v45, %v2338_v37  ;;  %v966_v54 = vpop.f32.mrf.mxu1  ;;  %v1060_v34 = vadd.f32 %v1059_v8, %v1011_v20 }
 0x17d   : > { %v1944_v55 = vpop.eup %1943  ;;  %v1318_v1 = vadd.f32 %v1302_v57, %v1100_v21  ;;  %v1185_v22 = vmul.f32 1.442695, %v1161_v28  ;;  %v967_v10 = vadd.f32 %v966_v54, %v918_v12  ;;  %v1104_v43 = vadd.f32 %v2419_v36, %v1060_v34 }
 0x17e   : > { %v1946_v15 = vpop.eup %1945  ;;  %v1208_v5 = vadd.f32 1.0, %v1944_v55 }
 0x17f   : > { %v1810_v19 = vpack.c.bf16 %v1318_v1, %v1317_v63  ;;  %1947 = vpow2.f32 %v1185_v22  ;;  %v2490_v7 = vadd.f32 %v2382_v59, %v967_v10  ;;  %v1230_v39 = vmul.f32 0.6931472, %v1946_v15 }
 0x180   : > { %1949 = vlog2.f32 %v1208_v5  ;;  %v1015_v31 = vpop.f32.mrf.mxu2 }
 0x181   : > { %1845 = vst [vmem:[%s2439_s23 + $0x10] sm:$0xff] %v1810_v19   ;;  %v1146_v37 = vand.u32 2147483647, %v2490_v7  ;;  %v1255_v44 = vadd.f32 %v1230_v39, %v1127_v18  ;;  %v1064_v45 = vpop.f32.mrf.mxu3  ;;  %v1016_v18 = vadd.f32 %v1015_v31, %v2340_v38 }
 0x182   : > { %v920_v42 = vpop.f32.mrf.mxu0 }
 0x183   : > { %v1162_v41 = vsub.f32 0.0, %v1146_v37  ;;  %v921_v25 = vadd.f32 %v920_v42, %v2345_v47  ;;  %v969_v11 = vpop.f32.mrf.mxu1  ;;  %v1303_v47 = vmul.f32 %v1779_v48, %v1255_v44  ;;  %v1014_v37 = vadd.f32 %v2485_v6, %v2336_v26 }
 0x184   : > { %v1129_v42 = vmax.f32 %v2481_v24, 0.0  ;;  %v1783_v48 = vunpack.c.l.bf16 %v1840_v13  ;;  %v1130_v26 = vmax.f32 %v2490_v7, 0.0  ;;  %v1784_v6 = vunpack.c.h.bf16 %v1840_v13 }
 0x185   : > { %v1948_v32 = vpop.eup %1947  ;;  %v1187_v4 = vmul.f32 1.442695, %v1162_v41  ;;  %v970_v33 = vadd.f32 %v969_v11, %v921_v25  ;;  %v1319_v54 = vadd.f32 %v1303_v47, %v1102_v17  ;;  %v1063_v58 = vadd.f32 %v2492_v23, %v1014_v37 }
 0x186   : > { %v1950_v46 = vpop.eup %1949  ;;  %v1209_v49 = vadd.f32 1.0, %v1948_v32 }
 0x187   : > { %v1232_v40 = vmul.f32 0.6931472, %v1950_v46  ;;  %1951 = vpow2.f32 %v1187_v4  ;;  %v2505_v16 = vadd.f32 %v2382_v59, %v970_v33  ;;  %v1106_v34 = vadd.f32 %v2419_v36, %v1063_v58 }
 0x188   : > { %1953 = vlog2.f32 %v1209_v49  ;;  %v1018_v15 = vpop.f32.mrf.mxu2 }
 0x189   : > { %v1256_v60 = vadd.f32 %v1232_v40, %v1128_v2  ;;  %v1147_v35 = vand.u32 2147483647, %v2505_v16  ;;  %v1067_v11 = vpop.f32.mrf.mxu3 }
 0x18a   : > { %v922_v21 = vpop.f32.mrf.mxu0 }
 0x18b   : > { %v1304_v56 = vmul.f32 %v1780_v0, %v1256_v60  ;;  %v1163_v57 = vsub.f32 0.0, %v1147_v35  ;;  %v923_v8 = vadd.f32 %v922_v21, %v2350_v61  ;;  %v971_v28 = vpop.f32.mrf.mxu1  ;;  %v1065_v0 = vadd.f32 %v1064_v45, %v1016_v18 }
 0x18d   : > { %v1952_v12 = vpop.eup %1951  ;;  %v1320_v55 = vadd.f32 %v1304_v56, %v1104_v43  ;;  %v1189_v63 = vmul.f32 1.442695, %v1163_v57  ;;  %v972_v1 = vadd.f32 %v971_v28, %v923_v8  ;;  %v1108_v23 = vadd.f32 %v2419_v36, %v1065_v0 }
 0x18e   : > { %v1954_v22 = vpop.eup %1953  ;;  %v1210_v10 = vadd.f32 1.0, %v1952_v12 }
 0x18f   : > { %v1815_v5 = vpack.c.bf16 %v1320_v55, %v1319_v54  ;;  %1955 = vpow2.f32 %v1189_v63  ;;  %v2512_v19 = vadd.f32 %v2382_v59, %v972_v1  ;;  %v1234_v39 = vmul.f32 0.6931472, %v1954_v22  ;;  %v1841_v22 = vld [vmem:[%s2405_s15 + $0x28] sm:$0xff]  }
 0x190   : > { %1957 = vlog2.f32 %v1210_v10  ;;  %v1019_v1 = vadd.f32 %v1018_v15, %v2348_v50  ;;  %v1788_v15 = vunpack.c.h.bf16 %v1841_v22 }
 0x191   : > { %1846 = vst [vmem:[%s2439_s23 + $0x18] sm:$0xff] %v1815_v5   ;;  %v1148_v61 = vand.u32 2147483647, %v2512_v19  ;;  %v1257_v44 = vadd.f32 %v1234_v39, %v1129_v42  ;;  %v1069_v12 = vpop.f32.mrf.mxu3  ;;  %v1131_v39 = vmax.f32 %v2505_v16, 0.0  ;;  %v1132_v50 = vmax.f32 %v2512_v19, 0.0 }
 0x192   : > { %v925_v30 = vpop.f32.mrf.mxu0 }
 0x193   : > { %v1164_v20 = vsub.f32 0.0, %v1148_v61  ;;  %v926_v41 = vadd.f32 %v925_v30, %v2358_v9  ;;  %v974_v25 = vpop.f32.mrf.mxu1  ;;  %v1020_v9 = vpop.f32.mrf.mxu2  ;;  %v1305_v31 = vmul.f32 %v1783_v48, %v1257_v44  ;;  %v1068_v44 = vadd.f32 %v1067_v11, %v1019_v1 }
 0x194   : > { %v1021_v61 = vadd.f32 %v1020_v9, %v2352_v62 }
 0x195   : > { %v1956_v32 = vpop.eup %1955  ;;  %v1191_v4 = vmul.f32 1.442695, %v1164_v20  ;;  %v975_v33 = vadd.f32 %v974_v25, %v926_v41  ;;  %v1321_v21 = vadd.f32 %v1305_v31, %v1106_v34  ;;  %v1787_v20 = vunpack.c.l.bf16 %v1841_v22 }
 0x196   : > { %v1958_v46 = vpop.eup %1957  ;;  %v1211_v2 = vadd.f32 1.0, %v1956_v32 }
 0x197   : > { %v1236_v24 = vmul.f32 0.6931472, %v1958_v46  ;;  %1959 = vpow2.f32 %v1191_v4  ;;  %v2525_v38 = vadd.f32 %v2382_v59, %v975_v33  ;;  %v1070_v33 = vadd.f32 %v1069_v12, %v1021_v61 }
 0x198   : > { %1961 = vlog2.f32 %v1211_v2 }
 0x199   : > { %v1258_v49 = vadd.f32 %v1236_v24, %v1130_v26  ;;  %v1149_v40 = vand.u32 2147483647, %v2525_v38  ;;  %v1110_v26 = vadd.f32 %v2419_v36, %v1068_v44  ;;  %v1112_v11 = vadd.f32 %v2419_v36, %v1070_v33 }
 0x19a   : > { %v927_v47 = vpop.f32.mrf.mxu0 }
 0x19b   : > { %v1306_v7 = vmul.f32 %v1784_v6, %v1258_v49  ;;  %v1165_v60 = vsub.f32 0.0, %v1149_v40  ;;  %v928_v35 = vadd.f32 %v927_v47, %v2362_v27  ;;  %v976_v17 = vpop.f32.mrf.mxu1  ;;  %v1023_v10 = vpop.f32.mrf.mxu2 }
 0x19d   : > { %v1960_v45 = vpop.eup %1959  ;;  %v1322_v43 = vadd.f32 %v1306_v7, %v1108_v23  ;;  %v1193_v56 = vmul.f32 1.442695, %v1165_v60  ;;  %v977_v57 = vadd.f32 %v976_v17, %v928_v35 }
 0x19e   : > { %v1962_v8 = vpop.eup %1961  ;;  %v1212_v28 = vadd.f32 1.0, %v1960_v45 }
 0x19f   : > { %v1820_v54 = vpack.c.bf16 %v1322_v43, %v1321_v21  ;;  %1963 = vpow2.f32 %v1193_v56  ;;  %v2532_v55 = vadd.f32 %v2382_v59, %v977_v57  ;;  %v1238_v63 = vmul.f32 0.6931472, %v1962_v8  ;;  %v1842_v21 = vld [vmem:[%s2405_s15 + $0x30] sm:$0xff]  }
 0x1a0   : > { %1965 = vlog2.f32 %v1212_v28  ;;  %v1133_v56 = vmax.f32 %v2525_v38, 0.0 }
 0x1a1   : > { %1847 = vst [vmem:[%s2439_s23 + $0x20] sm:$0xff] %v1820_v54   ;;  %v1150_v27 = vand.u32 2147483647, %v2532_v55  ;;  %v1259_v18 = vadd.f32 %v1238_v63, %v1131_v39  ;;  %v1791_v54 = vunpack.c.l.bf16 %v1842_v21  ;;  %v1134_v39 = vmax.f32 %v2532_v55, 0.0 }
 0x1a2   : > { %v930_v5 = vpop.f32.mrf.mxu0 }
 0x1a3   : > { %v1166_v37 = vsub.f32 0.0, %v1150_v27  ;;  %v931_v13 = vadd.f32 %v930_v5, %v2370_v51  ;;  %v979_v30 = vpop.f32.mrf.mxu1  ;;  %v1072_v51 = vpop.f32.mrf.mxu3  ;;  %v1307_v16 = vmul.f32 %v1787_v20, %v1259_v18 }
 0x1a4   : > { %v1025_v0 = vpop.f32.mrf.mxu2 }
 0x1a5   : > { %v1964_v42 = vpop.eup %1963  ;;  %v1195_v41 = vmul.f32 1.442695, %v1166_v37  ;;  %v980_v25 = vadd.f32 %v979_v30, %v931_v13  ;;  %v1323_v49 = vadd.f32 %v1307_v16, %v1110_v26  ;;  %v1026_v57 = vadd.f32 %v1025_v0, %v2364_v29 }
 0x1a6   : > { %v1966_v32 = vpop.eup %1965  ;;  %v1213_v48 = vadd.f32 1.0, %v1964_v42 }
 0x1a7   : > { %v1240_v4 = vmul.f32 0.6931472, %v1966_v32  ;;  %1967 = vpow2.f32 %v1195_v41  ;;  %v2543_v62 = vadd.f32 %v2382_v59, %v980_v25 }
 0x1a8   : > { %1969 = vlog2.f32 %v1213_v48 }
 0x1a9   : > { %v1260_v46 = vadd.f32 %v1240_v4, %v1132_v50  ;;  %v1151_v58 = vand.u32 2147483647, %v2543_v62  ;;  %v1843_v50 = vld [vmem:[%s2405_s15 + $0x38] sm:$0xff]  }
 0x1aa   : > { %v932_v6 = vpop.f32.mrf.mxu0 }
 0x1ab   : > { %v1308_v19 = vmul.f32 %v1788_v15, %v1260_v46  ;;  %v1167_v2 = vsub.f32 0.0, %v1151_v58  ;;  %v933_v24 = vadd.f32 %v932_v6, %v2374_v53  ;;  %v981_v9 = vpop.f32.mrf.mxu1  ;;  %v1024_v53 = vadd.f32 %v1023_v10, %v2360_v14  ;;  %v1074_v43 = vpop.f32.mrf.mxu3 }
 0x1ac   : > { %v1028_v5 = vpop.f32.mrf.mxu2  ;;  %v1075_v14 = vadd.f32 %v1074_v43, %v1026_v57  ;;  %v1135_v15 = vmax.f32 %v2543_v62, 0.0  ;;  %v1796_v58 = vunpack.c.h.bf16 %v1843_v50 }
 0x1ad   : > { %v1968_v31 = vpop.eup %1967  ;;  %v1324_v40 = vadd.f32 %v1308_v19, %v1112_v11  ;;  %v1197_v34 = vmul.f32 1.442695, %v1167_v2  ;;  %v982_v47 = vadd.f32 %v981_v9, %v933_v24  ;;  %v1073_v1 = vadd.f32 %v1072_v51, %v1024_v53 }
 0x1ae   : > { %v1970_v23 = vpop.eup %1969  ;;  %v1214_v7 = vadd.f32 1.0, %v1968_v31  ;;  %v1116_v37 = vadd.f32 %v2419_v36, %v1075_v14  ;;  %v1029_v48 = vadd.f32 %v1028_v5, %v2372_v52  ;;  %v1795_v51 = vunpack.c.l.bf16 %v1843_v50 }
 0x1af   : > { %v1825_v60 = vpack.c.bf16 %v1324_v40, %v1323_v49  ;;  %1971 = vpow2.f32 %v1197_v34  ;;  %v1119_v35 = vadd.f32 %v2382_v59, %v982_v47  ;;  %v1242_v17 = vmul.f32 0.6931472, %v1970_v23 }
 0x1b0   : > { %1973 = vlog2.f32 %v1214_v7  ;;  %v1792_v59 = vunpack.c.h.bf16 %v1842_v21  ;;  %v1114_v10 = vadd.f32 %v2419_v36, %v1073_v1 }
 0x1b1   : > { %1848 = vst [vmem:[%s2439_s23 + $0x28] sm:$0xff] %v1825_v60   ;;  %v1152_v45 = vand.u32 2147483647, %v1119_v35  ;;  %v1261_v12 = vadd.f32 %v1242_v17, %v1133_v56  ;;  %v1136_v6 = vmax.f32 %v1119_v35, 0.0 }
 0x1b3   : > { %v1168_v8 = vsub.f32 0.0, %v1152_v45  ;;  %v1309_v38 = vmul.f32 %v1791_v54, %v1261_v12  ;;  %v1077_v30 = vpop.f32.mrf.mxu3 }
 0x1b4   : > { %v1030_v32 = vpop.f32.mrf.mxu2  ;;  %v1078_v26 = vadd.f32 %v1077_v30, %v1029_v48 }
 0x1b5   : > { %v1972_v28 = vpop.eup %1971  ;;  %v1199_v63 = vmul.f32 1.442695, %v1168_v8  ;;  %v1325_v18 = vadd.f32 %v1309_v38, %v1114_v10  ;;  %v1031_v4 = vadd.f32 %v1030_v32, %v2376_v3 }
 0x1b6   : > { %v1974_v27 = vpop.eup %1973  ;;  %v1215_v22 = vadd.f32 1.0, %v1972_v28  ;;  %v1118_v3 = vadd.f32 %v2419_v36, %v1078_v26 }
 0x1b7   : > { %v1244_v61 = vmul.f32 0.6931472, %v1974_v27  ;;  %1975 = vpow2.f32 %v1199_v63 }
 0x1b8   : > { %1977 = vlog2.f32 %v1215_v22 }
 0x1b9   : > { %v1262_v29 = vadd.f32 %v1244_v61, %v1134_v39 }
 0x1bb   : > { %v1310_v13 = vmul.f32 %v1792_v59, %v1262_v29  ;;  %v1079_v46 = vpop.f32.mrf.mxu3 }
 0x1bc   : > { %v1080_v19 = vadd.f32 %v1079_v46, %v1031_v4 }
 0x1bd   : > { %v1976_v42 = vpop.eup %1975  ;;  %v1326_v20 = vadd.f32 %v1310_v13, %v1116_v37 }
 0x1be   : > { %v1978_v41 = vpop.eup %1977  ;;  %v1216_v55 = vadd.f32 1.0, %v1976_v42  ;;  %v1120_v2 = vadd.f32 %v2419_v36, %v1080_v19 }
 0x1bf   : > { %v1830_v25 = vpack.c.bf16 %v1326_v20, %v1325_v18  ;;  %v1246_v44 = vmul.f32 0.6931472, %v1978_v41 }
 0x1c0   : > { %1979 = vlog2.f32 %v1216_v55 }
 0x1c1   : > { %1849 = vst [vmem:[%s2439_s23 + $0x30] sm:$0xff] %v1830_v25   ;;  %v1263_v33 = vadd.f32 %v1246_v44, %v1135_v15 }
 0x1c3   : > { %v1311_v52 = vmul.f32 %v1795_v51, %v1263_v33 }
 0x1c5   : > { %v1327_v0 = vadd.f32 %v1311_v52, %v1118_v3 }
 0x1c6   : > { %v1980_v16 = vpop.eup %1979 }
 0x1c7   : > { %v1248_v11 = vmul.f32 0.6931472, %v1980_v16 }
 0x1c9   : > { %v1264_v62 = vadd.f32 %v1248_v11, %v1136_v6 }
 0x1cb   : > { %v1312_v24 = vmul.f32 %v1796_v58, %v1264_v62 }
 0x1cd   : > { %v1328_v9 = vadd.f32 %v1312_v24, %v1120_v2 }
 0x1cf   : > { %v1835_v31 = vpack.c.bf16 %v1328_v9, %v1327_v0 }
 0x1d1   : > { %1850 = vst [vmem:[%s2439_s23 + $0x38] sm:$0xff] %v1835_v31  }
 0x1d2   : > { %2068 = shalt.err (!%p2065_p8)
}
 0x1d3   : > { %s2119_s16 = smov 64   ;;  %s2120_s17 = smov 4  }
 0x1d4   : > { %1859 = dma.vmem_to_hbm [thread:$0]  (%p2189_p5), %s1375_s22, 1024, %s1377_s7, %s1362_s8, %s2119_s16, %s2119_s16, %s2120_s17  }
 0x1d5 PF: > { %p1876_p9 = scmp.ge.s32.totalorder %s2111_s21, 2  ;;  %s1391_s23 = sand.u32 1, %s2099_s18  }
 0x1d6   : > { %s1392_s25 = scalar_lea.sflag [#allocation4], %s1391_s23 }
 0x1d7   : > { %p1869_p10 = pnand %p1876_p9, %p2193_p6 }
 0x1d9   : > { %p1870_p11 = pneg %p1869_p10 }
 0x1db   : > { %2094 = dma.done.wait (%p1870_p11), %s1392_s25, 1024  }
 0x1dc   : > { %2096 = vsyncadd (%p1870_p11), %s1392_s25, 4294966272  ;;  %p17_p12 = scmp.ge.s32.totalorder %s2176_s24, 4   ;;  %s2609_s18 = smov %s2103_s19 }
 0x1dd   : > { %s2610_s19 = smov %s2107_s20  ;;  %s2611_s20 = smov %s2187_s27 }
 0x1de   : > { %s2612_s21 = smov %s2176_s24  ;;  %19 = sbr.rel (!%p17_p12) target bundleno = 5 (0x5), region = 88 }
 0x1e3   :  { %1398 = vsyncpa [#allocation3], 1 }
 0x1e4   :  { %1400 = vsyncpa [#allocation3 + $0x1], 1 }
 0x1e5   :  { %1401 = vsyncpa [#allocation6], 1 }
 0x1e6   :  { %1402 = vsyncpa [#allocation4], 1 }
 0x1e7   :  { %1404 = vsyncpa [#allocation4 + $0x1], 1 }

</bundles_post_ra>
